<compile_context>
chip_gen: v7x
topology: tpu7x:2x2x1
jax: 0.10.0
libtpu: 0.0.40
codegen_flags: <defaults>
</compile_context>

<pallas_src>
import functools

import jax
import jax.numpy as jnp
from jax.experimental import pallas as pl
from jax.experimental.pallas import tpu as pltpu


def _round_up(n, m):
    return -(-n // m) * m


def _mlp_kernel(*refs, num_layers, compute_dtype):
    """Fused MLP kernel.

    refs = (x_ref, w0_ref, b0_ref, w1_ref, b1_ref, ..., o_ref)
    Layers 0 .. num_layers-2 apply ReLU; the final layer is linear only.
    Weights are (in_p, out_p) in `compute_dtype` (bf16); biases (1, out_p) f32.
    """
    x_ref = refs[0]
    o_ref = refs[-1]
    param_refs = refs[1:-1]

    # Feed the MXU in compute_dtype; accumulate in f32.
    h = x_ref[...].astype(compute_dtype)
    for layer in range(num_layers):
        w = param_refs[2 * layer][...]            # bf16, fed directly to the MXU
        b = param_refs[2 * layer + 1][...]        # (1, out_p) f32, broadcasts
        acc = jnp.dot(h, w, preferred_element_type=jnp.float32) + b
        if layer != num_layers - 1:
            acc = jnp.maximum(acc, 0.0)           # ReLU on the f32 accumulator
            h = acc.astype(compute_dtype)         # narrow once for the next dot
        else:
            o_ref[...] = acc.astype(o_ref.dtype)  # lane-dense (out_p % 128 == 0)


def _choose_tile_m(B, block_m):
    """Pick the batch tile from a ladder, preferring (a) <=12.5% padding waste
    and (b) >=2 grid steps (v7x megacore), largest tile first; minimum 16."""
    if B <= 16:
        return 16
    ladder = [t for t in (1024, 512, 256, 128, 64, 32, 16) if t <= block_m]
    if not ladder:
        ladder = [16]

    def stats(t):
        padded = _round_up(B, t)
        return padded // t, (padded - B) / padded

    for min_steps in (2, 1):
        for t in ladder:                      # largest first
            steps, waste = stats(t)
            if steps >= min_steps and waste <= 0.125:
                return t
    # Awkward batch size: minimize waste, prefer the larger tile on ties.
    return min(ladder, key=lambda t: (stats(t)[1], -t))


def _vmem_bytes(tm, in_p, out_p, x_itemsize, out_itemsize, params):
    """Approximate VMEM footprint of the pipelined kernel."""
    params_bytes = sum(int(p.size) * p.dtype.itemsize for p in params)
    return (2 * tm * in_p * x_itemsize        # double-buffered x tiles
            + 2 * params_bytes                # params (default 2-deep buffering)
            + 2 * tm * out_p * out_itemsize)  # double-buffered output tiles


def mlp_forward(x, weights, biases, *, param_dtype=jnp.bfloat16,
                out_dtype=jnp.bfloat16, block_m=1024):
    """x: [B, C, H, W] (NCHW). weights[i]: (in_i, out_i); biases[i]: (out_i,)."""
    B = x.shape[0]
    x2d = x.reshape(B, -1)                        # nn.Flatten (row-major)
    in_dim = x2d.shape[1]
    num_layers = len(weights)
    out_dim = weights[-1].shape[1]

    # Lane-pad the input dim and each layer's output dim to multiples of 128.
    # Zero padding is exact: padded x cols are 0, pad bias = 0, ReLU(0) = 0,
    # and pad rows of the next W are 0.
    in_p = _round_up(in_dim, 128)
    padded_out = [_round_up(w.shape[1], 128) for w in weights]
    padded_in = [in_p] + padded_out[:-1]
    out_p = padded_out[-1]

    params = []
    for li, (w, b) in enumerate(zip(weights, biases)):
        wp = jnp.zeros((padded_in[li], padded_out[li]), param_dtype)
        wp = wp.at[: w.shape[0], : w.shape[1]].set(w.astype(param_dtype))
        bp = jnp.zeros((1, padded_out[li]), jnp.float32)
        bp = bp.at[0, : b.shape[0]].set(b.astype(jnp.float32))
        params += [wp, bp]

    # Batch tile: ladder choice, then shrink if the VMEM footprint would blow
    # past a budget that leaves headroom on v7x (64 MiB physical VMEM).
    tm = _choose_tile_m(B, block_m)
    x_itemsize = x2d.dtype.itemsize
    out_itemsize = jnp.dtype(out_dtype).itemsize
    vmem_budget = 44 << 20
    while tm > 16 and _vmem_bytes(tm, in_p, out_p, x_itemsize, out_itemsize,
                                  params) > vmem_budget:
        tm //= 2

    b_padded = _round_up(B, tm)
    pad_rows = b_padded - B
    pad_cols = in_p - in_dim
    if pad_rows or pad_cols:
        x2d = jnp.pad(x2d, ((0, pad_rows), (0, pad_cols)))
    grid = (b_padded // tm,)

    kernel = functools.partial(_mlp_kernel, num_layers=num_layers,
                               compute_dtype=param_dtype)

    # x tile marches over the batch; params are full-array blocks with a
    # constant block index so they stay resident in VMEM across grid steps.
    in_specs = [pl.BlockSpec((tm, in_p), lambda i: (i, 0))]
    for p in params:
        in_specs.append(pl.BlockSpec(p.shape, lambda i: (0, 0)))

    flops = 2 * b_padded * sum(pi * po for pi, po in zip(padded_in, padded_out))
    bytes_accessed = (x2d.size * x2d.dtype.itemsize
                      + sum(int(p.size) * p.dtype.itemsize for p in params)
                      + b_padded * out_p * out_itemsize)
    cost = pl.CostEstimate(flops=int(flops), transcendentals=0,
                           bytes_accessed=int(bytes_accessed))

    compiler_kwargs = dict(dimension_semantics=("parallel",))
    vmem_needed = _vmem_bytes(tm, in_p, out_p, x_itemsize, out_itemsize, params)
    vmem_request = int(vmem_needed * 1.25) + (1 << 20)   # 25% + 1 MiB headroom
    if vmem_request > (16 << 20):   # exceeds the smallest (v5e) scoped default
        compiler_kwargs["vmem_limit_bytes"] = vmem_request

    out_padded = pl.pallas_call(
        kernel,
        out_shape=jax.ShapeDtypeStruct((b_padded, out_p), out_dtype),
        grid=grid,
        in_specs=in_specs,
        out_specs=pl.BlockSpec((tm, out_p), lambda i: (i, 0)),
        compiler_params=pltpu.CompilerParams(**compiler_kwargs),
        cost_estimate=cost,
    )(x2d, *params)

    return out_padded[:B, :out_dim].astype(x.dtype)


def init_mlp_params(key, in_dim, out_dim, intermediate_dim, num_hidden_layers=1):
    """Deterministic synthetic params. Weight layout: (in_features, out_features)."""
    dims = [in_dim, intermediate_dim]
    for _ in range(num_hidden_layers):
        dims.append(intermediate_dim)
    dims.append(out_dim)

    weights, biases = [], []
    for i in range(len(dims) - 1):
        key, kw, kb = jax.random.split(key, 3)
        fan_in = dims[i]
        scale = 1.0 / jnp.sqrt(jnp.float32(fan_in))
        weights.append(jax.random.uniform(kw, (dims[i], dims[i + 1]),
                                          dtype=jnp.float32,
                                          minval=-scale, maxval=scale))
        biases.append(jax.random.uniform(kb, (dims[i + 1],), dtype=jnp.float32,
                                         minval=-scale, maxval=scale))
    return weights, biases


def _reference_mlp(x, weights, biases, param_dtype=jnp.bfloat16,
                   out_dtype=jnp.bfloat16):
    """Pure-JAX reference using the same bf16-MXU / f32-accumulate recipe
    (and the same final bf16 store) so numerics are directly comparable."""
    h = x.reshape(x.shape[0], -1)
    for i, (w, b) in enumerate(zip(weights, biases)):
        h = jnp.dot(h.astype(param_dtype), w.astype(param_dtype),
                    preferred_element_type=jnp.float32) + b
        if i != len(weights) - 1:
            h = jnp.maximum(h, 0.0)
    return h.astype(out_dtype).astype(x.dtype)


if __name__ == "__main__":
    key = jax.random.PRNGKey(0)
    B, C, H, W = 2, 4, 16, 16
    in_dim = C * H * W              # 1024 (flattened)
    intermediate_dim = 32
    out_dim = 10
    num_hidden_layers = 1

    kx, kp = jax.random.split(key)
    x = jax.random.normal(kx, (B, C, H, W), dtype=jnp.float32)
    weights, biases = init_mlp_params(kp, in_dim, out_dim, intermediate_dim,
                                      num_hidden_layers)

    logits = mlp_forward(x, weights, biases)
    jax.block_until_ready(logits)

    ref = _reference_mlp(x, weights, biases)

    assert logits.shape == (B, out_dim)
    assert jnp.allclose(logits, ref, atol=2e-2, rtol=2e-2)

    print("KERNEL_OK")
</pallas_src>

<mosaic_0001>
module attributes {stable_mosaic.version = 11 : i64} {
  func.func @_mlp_kernel(%arg0: i32, %arg1: memref<16x1024xf32, #tpu.memory_space<vmem>>, %arg2: memref<1024x128xbf16, #tpu.memory_space<vmem>>, %arg3: memref<1x128xf32, #tpu.memory_space<vmem>>, %arg4: memref<128x128xbf16, #tpu.memory_space<vmem>>, %arg5: memref<1x128xf32, #tpu.memory_space<vmem>>, %arg6: memref<128x128xbf16, #tpu.memory_space<vmem>>, %arg7: memref<1x128xf32, #tpu.memory_space<vmem>>, %arg8: memref<16x128xbf16, #tpu.memory_space<vmem>>) attributes {dimension_semantics = [#tpu.dimension_semantics<parallel>], iteration_bounds = array<i64: 1>, scalar_prefetch = 0 : i64, scratch_operands = 0 : i64, tpu.core_type = #tpu.core_type<tc>, window_params = [{transform_indices = @transform_0, window_bounds = array<i64: 16, 1024>}, {pipeline_mode = #tpu.pipeline_mode<synchronous>, transform_indices = @transform_1, window_bounds = array<i64: 1024, 128>}, {pipeline_mode = #tpu.pipeline_mode<synchronous>, transform_indices = @transform_2, window_bounds = array<i64: 1, 128>}, {pipeline_mode = #tpu.pipeline_mode<synchronous>, transform_indices = @transform_3, window_bounds = array<i64: 128, 128>}, {pipeline_mode = #tpu.pipeline_mode<synchronous>, transform_indices = @transform_4, window_bounds = array<i64: 1, 128>}, {pipeline_mode = #tpu.pipeline_mode<synchronous>, transform_indices = @transform_5, window_bounds = array<i64: 128, 128>}, {pipeline_mode = #tpu.pipeline_mode<synchronous>, transform_indices = @transform_6, window_bounds = array<i64: 1, 128>}, {transform_indices = @transform_7, window_bounds = array<i64: 16, 128>}]} {
    %c0 = arith.constant 0 : index
    %c0_0 = arith.constant 0 : index
    %0 = vector.load %arg1[%c0, %c0_0] : memref<16x1024xf32, #tpu.memory_space<vmem>>, vector<16x1024xf32>
    %1 = arith.truncf %0 : vector<16x1024xf32> to vector<16x1024xbf16>
    %c0_1 = arith.constant 0 : index
    %c0_2 = arith.constant 0 : index
    %2 = vector.load %arg2[%c0_1, %c0_2] : memref<1024x128xbf16, #tpu.memory_space<vmem>>, vector<1024x128xbf16>
    %c0_3 = arith.constant 0 : index
    %c0_4 = arith.constant 0 : index
    %3 = vector.load %arg3[%c0_3, %c0_4] : memref<1x128xf32, #tpu.memory_space<vmem>>, vector<1x128xf32>
    %cst = arith.constant dense<0.000000e+00> : vector<16x128xf32>
    %4 = tpu.matmul %1, %2, %cst {dimension_numbers = #tpu.dot_dimension_numbers<[1], [0], [0], [1], [0, 0, 1, 1], [], []>} : vector<16x1024xbf16>, vector<1024x128xbf16>, vector<16x128xf32> -> vector<16x128xf32>
    %5 = vector.broadcast %3 : vector<1x128xf32> to vector<16x128xf32>
    %6 = arith.addf %4, %5 : vector<16x128xf32>
    %cst_5 = arith.constant 0.000000e+00 : f32
    %7 = vector.broadcast %cst_5 : f32 to vector<16x128xf32>
    %8 = arith.maximumf %6, %7 : vector<16x128xf32>
    %9 = arith.truncf %8 : vector<16x128xf32> to vector<16x128xbf16>
    %c0_6 = arith.constant 0 : index
    %c0_7 = arith.constant 0 : index
    %10 = vector.load %arg4[%c0_6, %c0_7] : memref<128x128xbf16, #tpu.memory_space<vmem>>, vector<128x128xbf16>
    %c0_8 = arith.constant 0 : index
    %c0_9 = arith.constant 0 : index
    %11 = vector.load %arg5[%c0_8, %c0_9] : memref<1x128xf32, #tpu.memory_space<vmem>>, vector<1x128xf32>
    %cst_10 = arith.constant dense<0.000000e+00> : vector<16x128xf32>
    %12 = tpu.matmul %9, %10, %cst_10 {dimension_numbers = #tpu.dot_dimension_numbers<[1], [0], [0], [1], [0, 0, 1, 1], [], []>} : vector<16x128xbf16>, vector<128x128xbf16>, vector<16x128xf32> -> vector<16x128xf32>
    %13 = vector.broadcast %11 : vector<1x128xf32> to vector<16x128xf32>
    %14 = arith.addf %12, %13 : vector<16x128xf32>
    %cst_11 = arith.constant 0.000000e+00 : f32
    %15 = vector.broadcast %cst_11 : f32 to vector<16x128xf32>
    %16 = arith.maximumf %14, %15 : vector<16x128xf32>
    %17 = arith.truncf %16 : vector<16x128xf32> to vector<16x128xbf16>
    %c0_12 = arith.constant 0 : index
    %c0_13 = arith.constant 0 : index
    %18 = vector.load %arg6[%c0_12, %c0_13] : memref<128x128xbf16, #tpu.memory_space<vmem>>, vector<128x128xbf16>
    %c0_14 = arith.constant 0 : index
    %c0_15 = arith.constant 0 : index
    %19 = vector.load %arg7[%c0_14, %c0_15] : memref<1x128xf32, #tpu.memory_space<vmem>>, vector<1x128xf32>
    %cst_16 = arith.constant dense<0.000000e+00> : vector<16x128xf32>
    %20 = tpu.matmul %17, %18, %cst_16 {dimension_numbers = #tpu.dot_dimension_numbers<[1], [0], [0], [1], [0, 0, 1, 1], [], []>} : vector<16x128xbf16>, vector<128x128xbf16>, vector<16x128xf32> -> vector<16x128xf32>
    %21 = vector.broadcast %19 : vector<1x128xf32> to vector<16x128xf32>
    %22 = arith.addf %20, %21 : vector<16x128xf32>
    %23 = arith.truncf %22 : vector<16x128xf32> to vector<16x128xbf16>
    %c0_17 = arith.constant 0 : index
    %c0_18 = arith.constant 0 : index
    %24 = vector.load %arg8[%c0_17, %c0_18] : memref<16x128xbf16, #tpu.memory_space<vmem>>, vector<16x128xbf16>
    tpu.vector_store %arg8[%c0_17, %c0_18], %23 {strides = array<i32>} : memref<16x128xbf16, #tpu.memory_space<vmem>>, vector<16x128xbf16>,
    return
  }
  func.func @transform_0(%arg0: i32) -> (i32, i32) {
    %c0_i32 = arith.constant 0 : i32
    %c0_i32_0 = arith.constant 0 : i32
    return %arg0, %c0_i32 : i32, i32
  }
  func.func @transform_1(%arg0: i32) -> (i32, i32) {
    %c0_i32 = arith.constant 0 : i32
    %c0_i32_0 = arith.constant 0 : i32
    %c0_i32_1 = arith.constant 0 : i32
    return %c0_i32, %c0_i32_0 : i32, i32
  }
  func.func @transform_2(%arg0: i32) -> (i32, i32) {
    %c0_i32 = arith.constant 0 : i32
    %c0_i32_0 = arith.constant 0 : i32
    %c0_i32_1 = arith.constant 0 : i32
    return %c0_i32, %c0_i32_0 : i32, i32
  }
  func.func @transform_3(%arg0: i32) -> (i32, i32) {
    %c0_i32 = arith.constant 0 : i32
    %c0_i32_0 = arith.constant 0 : i32
    %c0_i32_1 = arith.constant 0 : i32
    return %c0_i32, %c0_i32_0 : i32, i32
  }
  func.func @transform_4(%arg0: i32) -> (i32, i32) {
    %c0_i32 = arith.constant 0 : i32
    %c0_i32_0 = arith.constant 0 : i32
    %c0_i32_1 = arith.constant 0 : i32
    return %c0_i32, %c0_i32_0 : i32, i32
  }
  func.func @transform_5(%arg0: i32) -> (i32, i32) {
    %c0_i32 = arith.constant 0 : i32
    %c0_i32_0 = arith.constant 0 : i32
    %c0_i32_1 = arith.constant 0 : i32
    return %c0_i32, %c0_i32_0 : i32, i32
  }
  func.func @transform_6(%arg0: i32) -> (i32, i32) {
    %c0_i32 = arith.constant 0 : i32
    %c0_i32_0 = arith.constant 0 : i32
    %c0_i32_1 = arith.constant 0 : i32
    return %c0_i32, %c0_i32_0 : i32, i32
  }
  func.func @transform_7(%arg0: i32) -> (i32, i32) {
    %c0_i32 = arith.constant 0 : i32
    %c0_i32_0 = arith.constant 0 : i32
    return %arg0, %c0_i32 : i32, i32
  }
}

</mosaic_0001>

<bundles_post_ra>
// kernel: tpu_custom_call.1
= control target key start
LH: loop header
LB: loop body
LE: loop exit
PB: predicated region body
PF: predicated region fallthrough
CT: control target
= control target key end

     0   :  { %12 = vsyncpa [#allocation3], 0  ;;  %s1645_s0 = inlined_call_operand.hbm [shape: f32[16,1024], index: 0, kind: input, shape index: {}]   ;;  %s1646_s1 = inlined_call_operand.hbm [shape: bf16[1024,128], index: 1, kind: input, shape index: {}]   ;;  %s1647_s2 = inlined_call_operand.vmem [shape: f32[1,128], index: 2, kind: input, shape index: {}]   ;;  %s1648_s3 = inlined_call_operand.hbm [shape: bf16[128,128], index: 3, kind: input, shape index: {}]   ;;  %s1649_s4 = inlined_call_operand.vmem [shape: f32[1,128], index: 4, kind: input, shape index: {}]   ;;  %s1650_s5 = inlined_call_operand.hbm [shape: bf16[128,128], index: 5, kind: input, shape index: {}]   ;;  %s1651_s6 = inlined_call_operand.vmem [shape: f32[1,128], index: 6, kind: input, shape index: {}]   ;;  %s1652_s7 = inlined_call_operand.hbm [shape: bf16[16,128], index: 7, kind: output, shape index: {}]  }
   0x1   :  { %13 = vsyncpa [#allocation6], 0 }
   0x2   :  { %14 = vsyncpa [#allocation9], 0 }
   0x3   :  { %15 = vsyncpa [#allocation4], 0  ;;  %s1495_s24 = smov [#allocation5]   ;;  %s1377_s28 = scalar_lea.hbm %s1646_s1, 8192 }
   0x4   :  { %s33_s25 = sshll.u32 %s1495_s24, 4  ;;  %p1378_p0 = scmp.ne.s32.totalorder %s1646_s1, %s1377_s28  ;;  %s34_s25 = int_to_ptr.vmem [resolvable:$true] %s33_s25 }
   0x5   :  { %p1381_p1 = scmp.lt.u32.totalorder %s1377_s28, %s1646_s1 }
   0x7   :  { %p1383_p2 = pnand %p1381_p1, %p1378_p0 }
   0x9   :  { %1386 = shalt.err (!%p1383_p2)
}
   0xa   :  { %s1387_s10 = scalar_lea.vmem %s34_s25, 8192  ;;  %p1392_p4 = scmp.lt.s32.totalorder %s34_s25, %s34_s25 }
   0xb   :  { %p1388_p3 = scmp.ne.s32.totalorder %s34_s25, %s1387_s10  ;;  %p1393_p5 = scmp.lt.s32.totalorder %s1387_s10, %s1387_s10 }
   0xd   :  { %p1394_p6 = por %p1393_p5, %p1392_p4 }
   0xf   :  { %p1395_p7 = pnand %p1394_p6, %p1388_p3 }
  0x11   :  { %1398 = shalt.err (!%p1395_p7)
}
  0x12   :  { %s1496_s11 = smov 64   ;;  %s1497_s12 = smov 4  }
  0x13   :  { %39 = dma.hbm_to_vmem [thread:$0]  %s1646_s1, 8192, %s34_s25, [#allocation6], %s1496_s11, %s1496_s11, %s1497_s12  }
  0x14   :  { %s1498_s15 = smov [#allocation2]   ;;  %s1399_s19 = scalar_lea.hbm %s1645_s0, 2048 }
  0x15   :  { %s21_s16 = sshll.u32 %s1498_s15, 4  ;;  %p1400_p8 = scmp.ne.s32.totalorder %s1645_s0, %s1399_s19  ;;  %s22_s16 = int_to_ptr.vmem [resolvable:$true] %s21_s16 }
  0x16   :  { %p1403_p9 = scmp.lt.u32.totalorder %s1399_s19, %s1645_s0 }
  0x18   :  { %p1405_p10 = pnand %p1403_p9, %p1400_p8 }
  0x1a   :  { %1408 = shalt.err (!%p1405_p10)
}
  0x1b   :  { %s1409_s24 = scalar_lea.vmem %s22_s16, 2048  ;;  %p1414_p12 = scmp.lt.s32.totalorder %s22_s16, %s22_s16 }
  0x1c   :  { %p1410_p11 = scmp.ne.s32.totalorder %s22_s16, %s1409_s24  ;;  %p1415_p13 = scmp.lt.s32.totalorder %s1409_s24, %s1409_s24 }
  0x1e   :  { %p1416_p0 = por %p1415_p13, %p1414_p12 }
  0x20   :  { %p1417_p1 = pnand %p1416_p0, %p1410_p11 }
  0x22   :  { %1420 = shalt.err (!%p1417_p1)
}
  0x23   :  { %s1499_s1 = smov 1024   ;;  %s1500_s27 = smov [#allocation7]  }
  0x24   :  { %27 = dma.hbm_to_vmem [thread:$0]  %s1645_s0, 2048, %s22_s16, [#allocation3], %s1499_s1, %s1499_s1, %s1496_s11  }
  0x25   :  { %s47_s28 = sshll.u32 %s1500_s27, 4  ;;  %s1501_s29 = smov [#allocation8]   ;;  %s48_s28 = int_to_ptr.vmem [resolvable:$true] %s47_s28 }
  0x26   :  { %s61_s30 = sshll.u32 %s1501_s29, 4  ;;  %s1421_s10 = scalar_lea.hbm %s1648_s3, 1024  ;;  %s62_s30 = int_to_ptr.vmem [resolvable:$true] %s61_s30 }
  0x27   :  { %p1422_p2 = scmp.ne.s32.totalorder %s1648_s3, %s1421_s10  ;;  %p1425_p3 = scmp.lt.u32.totalorder %s1421_s10, %s1648_s3 }
  0x29   :  { %p1427_p4 = pnand %p1425_p3, %p1422_p2 }
  0x2b   :  { %1430 = shalt.err (!%p1427_p4)
}
  0x2c   :  { %s1431_s0 = scalar_lea.vmem %s48_s28, 1024  ;;  %p1436_p6 = scmp.lt.s32.totalorder %s48_s28, %s48_s28 }
  0x2d   :  { %p1432_p5 = scmp.ne.s32.totalorder %s48_s28, %s1431_s0  ;;  %p1437_p7 = scmp.lt.s32.totalorder %s1431_s0, %s1431_s0 }
  0x2f   :  { %p1438_p8 = por %p1437_p7, %p1436_p6 }
  0x31   :  { %p1439_p9 = pnand %p1438_p8, %p1432_p5 }
  0x33   :  { %1442 = shalt.err (!%p1439_p9)
}
  0x34   :  { %53 = dma.hbm_to_vmem [thread:$0]  %s1648_s3, 1024, %s48_s28, [#allocation6], %s1496_s11, %s1496_s11, %s1497_s12  }
  0x35   :  { %s1443_s21 = scalar_lea.hbm %s1650_s5, 1024 }
  0x36   :  { %p1444_p10 = scmp.ne.s32.totalorder %s1650_s5, %s1443_s21  ;;  %p1447_p11 = scmp.lt.u32.totalorder %s1443_s21, %s1650_s5 }
  0x38   :  { %p1449_p12 = pnand %p1447_p11, %p1444_p10 }
  0x3a   :  { %1452 = shalt.err (!%p1449_p12)
}
  0x3b   :  { %s1453_s25 = scalar_lea.vmem %s62_s30, 1024  ;;  %p1458_p0 = scmp.lt.s32.totalorder %s62_s30, %s62_s30 }
  0x3c   :  { %p1454_p13 = scmp.ne.s32.totalorder %s62_s30, %s1453_s25  ;;  %p1459_p1 = scmp.lt.s32.totalorder %s1453_s25, %s1453_s25 }
  0x3e   :  { %p1460_p2 = por %p1459_p1, %p1458_p0 }
  0x40   :  { %p1461_p3 = pnand %p1460_p2, %p1454_p13 }
  0x42   :  { %1464 = shalt.err (!%p1461_p3)
}
  0x43   :  { %67 = dma.hbm_to_vmem [thread:$0]  %s1650_s5, 1024, %s62_s30, [#allocation9], %s1496_s11, %s1496_s11, %s1497_s12  }
  0x44   :  { %1487 = dma.done.wait [#allocation3], 2048  }
  0x45   :  { %1488 = vsyncadd [#allocation3], 4294965248 }
  0x46   :  { %1489 = dma.done.wait [#allocation6], 9216  }
  0x47   :  { %1490 = vsyncadd [#allocation6], 4294958080 }
  0x48   :  { %1491 = dma.done.wait [#allocation9], 1024  }
  0x49   :  { %1492 = vsyncadd [#allocation9], 4294966272  ;;  %v1297_v0 = vld [vmem:[#allocation5 + $0x40] sm:$0xff]   ;;  %v1301_v4 = vld [vmem:[#allocation5 + $0x48] sm:$0xff]   ;;  %vm1503_vm0 = vmmov 0   ;;  %s1504_s8 = smov [#allocation10]  }
  0x4a   :  { %v1298_v1 = vld [vmem:[#allocation5 + $0xc0] sm:$0xff]   ;;  %1141 = vmatprep.subr.bf16.mxu0 %v1297_v0  ;;  %v1302_v5 = vld [vmem:[#allocation5 + $0xc8] sm:$0xff]   ;;  %v1305_v8 = vld [vmem:[#allocation5 + $0x50] sm:$0xff]   ;;  %s1035_s9 = sshll.u32 %s1504_s8, 4  ;;  %s1036_s9 = int_to_ptr.vmem [resolvable:$true] %s1035_s9 }
  0x4b   :  { %v1299_v2 = vld [vmem:[#allocation5] sm:$0xff]   ;;  %1163 = vmatprep.subr.bf16.mxu1 %v1298_v1  ;;  %v1303_v6 = vld [vmem:[#allocation5 + $0x8] sm:$0xff]   ;;  %v1306_v9 = vld [vmem:[#allocation5 + $0xd0] sm:$0xff]   ;;  %p1470_p5 = scmp.lt.s32.totalorder %s1036_s9, %s1036_s9 }
  0x4c   :  { %v1300_v3 = vld [vmem:[#allocation5 + $0x80] sm:$0xff]   ;;  %1142 = vmatpush3.bf16.msra.mxu0 %v1299_v2  ;;  %v1304_v7 = vld [vmem:[#allocation5 + $0x88] sm:$0xff]   ;;  %v1307_v10 = vld [vmem:[#allocation5 + $0x10] sm:$0xff]  }
  0x4d   :  { %1164 = vmatpush3.bf16.msra.mxu1 %v1300_v3  ;;  %1143 = vmatprep.subr.bf16.mxu0 %v1301_v4  ;;  %v1308_v11 = vld [vmem:[#allocation5 + $0x90] sm:$0xff]   ;;  %v1309_v12 = vld [vmem:[#allocation5 + $0x58] sm:$0xff]   ;;  %v1313_v16 = vld [vmem:[#allocation5 + $0x60] sm:$0xff]  }
  0x4e   :  { %1165 = vmatprep.subr.bf16.mxu1 %v1302_v5  ;;  %v1310_v13 = vld [vmem:[#allocation5 + $0xd8] sm:$0xff]   ;;  %v1314_v17 = vld [vmem:[#allocation5 + $0xe0] sm:$0xff]   ;;  %v1317_v20 = vld [vmem:[#allocation5 + $0x68] sm:$0xff]  }
  0x4f   :  { %v1311_v14 = vld [vmem:[#allocation5 + $0x18] sm:$0xff]   ;;  %v1315_v18 = vld [vmem:[#allocation5 + $0x20] sm:$0xff]   ;;  %v1318_v21 = vld [vmem:[#allocation5 + $0xe8] sm:$0xff]  }
  0x50   :  { %1144 = vmatpush3.bf16.msra.mxu0 %v1303_v6  ;;  %v1312_v15 = vld [vmem:[#allocation5 + $0x98] sm:$0xff]   ;;  %v1316_v19 = vld [vmem:[#allocation5 + $0xa0] sm:$0xff]   ;;  %v1319_v22 = vld [vmem:[#allocation5 + $0x28] sm:$0xff]  }
  0x51   :  { %1166 = vmatpush3.bf16.msra.mxu1 %v1304_v7  ;;  %1145 = vmatprep.subr.bf16.mxu0 %v1305_v8  ;;  %v1320_v23 = vld [vmem:[#allocation5 + $0xa8] sm:$0xff]   ;;  %v1321_v24 = vld [vmem:[#allocation5 + $0x70] sm:$0xff]   ;;  %v1325_v28 = vld [vmem:[#allocation5 + $0x78] sm:$0xff]  }
  0x52   :  { %1167 = vmatprep.subr.bf16.mxu1 %v1306_v9  ;;  %v1322_v25 = vld [vmem:[#allocation5 + $0xf0] sm:$0xff]   ;;  %v1326_v29 = vld [vmem:[#allocation5 + $0xf8] sm:$0xff]   ;;  %v84_v32 = vld [vmem:[#allocation2 + $0x8] sm:$0xff] }
  0x53   :  { %v1323_v26 = vld [vmem:[#allocation5 + $0x30] sm:$0xff]   ;;  %v1327_v30 = vld [vmem:[#allocation5 + $0x38] sm:$0xff]   ;;  %v92_v33 = vld [vmem:[#allocation2 + $0x48] sm:$0xff] }
  0x54   :  { %1146 = vmatpush3.bf16.msra.mxu0 %v1307_v10  ;;  %v1324_v27 = vld [vmem:[#allocation5 + $0xb0] sm:$0xff]   ;;  %v1328_v31 = vld [vmem:[#allocation5 + $0xb8] sm:$0xff]   ;;  %v100_v35 = vpack.c.bf16 %v92_v33, %v84_v32  ;;  %v83_v37 = vld [vmem:[#allocation2] sm:$0xff] }
  0x55   :  { %1168 = vmatpush3.bf16.msra.mxu1 %v1308_v11  ;;  %1147 = vmatprep.subr.bf16.mxu0 %v1309_v12  ;;  %v86_v34 = vld [vmem:[#allocation2 + $0x18] sm:$0xff]  ;;  %v91_v38 = vld [vmem:[#allocation2 + $0x40] sm:$0xff]  ;;  %v85_v41 = vld [vmem:[#allocation2 + $0x10] sm:$0xff] }
  0x56   :  { %1169 = vmatprep.subr.bf16.mxu1 %v1310_v13  ;;  %v94_v36 = vld [vmem:[#allocation2 + $0x58] sm:$0xff]  ;;  %v99_v40 = vpack.c.bf16 %v91_v38, %v83_v37  ;;  %v93_v42 = vld [vmem:[#allocation2 + $0x50] sm:$0xff]  ;;  %658 = vmatprep.mubr.bf16.mxu0 %v100_v35  ;;  %v1329_v44 = vld [vmem:[#allocation5 + $0x140] sm:$0xff]  }
  0x57   :  { %v102_v39 = vpack.c.bf16 %v94_v36, %v86_v34  ;;  %v101_v43 = vpack.c.bf16 %v93_v42, %v85_v41  ;;  %v1330_v45 = vld [vmem:[#allocation5 + $0x1c0] sm:$0xff]   ;;  %v1333_v48 = vld [vmem:[#allocation5 + $0x148] sm:$0xff]   ;;  %v1337_v52 = vld [vmem:[#allocation5 + $0x150] sm:$0xff]  }
  0x58   :  { %1148 = vmatpush3.bf16.msra.mxu0 %v1311_v14  ;;  %v1331_v46 = vld [vmem:[#allocation5 + $0x100] sm:$0xff]   ;;  %v1334_v49 = vld [vmem:[#allocation5 + $0x1c8] sm:$0xff]   ;;  %v1338_v53 = vld [vmem:[#allocation5 + $0x1d0] sm:$0xff]  }
  0x59   :  { %1170 = vmatpush3.bf16.msra.mxu1 %v1312_v15  ;;  %1149 = vmatprep.subr.bf16.mxu0 %v1313_v16  ;;  %v1332_v47 = vld [vmem:[#allocation5 + $0x180] sm:$0xff]   ;;  %v1335_v50 = vld [vmem:[#allocation5 + $0x108] sm:$0xff]   ;;  %v1339_v54 = vld [vmem:[#allocation5 + $0x110] sm:$0xff]  }
  0x5a   :  { %1171 = vmatprep.subr.bf16.mxu1 %v1314_v17  ;;  %699 = vmatprep.mubr.bf16.mxu1 %v102_v39  ;;  %v1336_v51 = vld [vmem:[#allocation5 + $0x188] sm:$0xff]   ;;  %v1340_v55 = vld [vmem:[#allocation5 + $0x190] sm:$0xff]   ;;  %v1341_v56 = vld [vmem:[#allocation5 + $0x158] sm:$0xff]  }
  0x5b   :  { %v1342_v57 = vld [vmem:[#allocation5 + $0x1d8] sm:$0xff]   ;;  %v1345_v60 = vld [vmem:[#allocation5 + $0x160] sm:$0xff]   ;;  %v1349_v0 = vld [vmem:[#allocation5 + $0x168] sm:$0xff]  }
  0x5c   :  { %1150 = vmatpush3.bf16.msra.mxu0 %v1315_v18  ;;  %v1343_v58 = vld [vmem:[#allocation5 + $0x118] sm:$0xff]   ;;  %v1346_v61 = vld [vmem:[#allocation5 + $0x1e0] sm:$0xff]   ;;  %v1350_v1 = vld [vmem:[#allocation5 + $0x1e8] sm:$0xff]  }
  0x5d   :  { %1172 = vmatpush3.bf16.msra.mxu1 %v1316_v19  ;;  %1151 = vmatprep.subr.bf16.mxu0 %v1317_v20  ;;  %v1344_v59 = vld [vmem:[#allocation5 + $0x198] sm:$0xff]   ;;  %v1347_v62 = vld [vmem:[#allocation5 + $0x120] sm:$0xff]   ;;  %v1351_v2 = vld [vmem:[#allocation5 + $0x128] sm:$0xff]  }
  0x5e   :  { %1173 = vmatprep.subr.bf16.mxu1 %v1318_v21  ;;  %v1348_v63 = vld [vmem:[#allocation5 + $0x1a0] sm:$0xff]   ;;  %v1352_v3 = vld [vmem:[#allocation5 + $0x1a8] sm:$0xff]   ;;  %v1353_v4 = vld [vmem:[#allocation5 + $0x170] sm:$0xff]  }
  0x5f   :  { %v1354_v5 = vld [vmem:[#allocation5 + $0x1f0] sm:$0xff]   ;;  %v1357_v8 = vld [vmem:[#allocation5 + $0x178] sm:$0xff]   ;;  %v88_v12 = vld [vmem:[#allocation2 + $0x28] sm:$0xff] }
  0x60   :  { %1152 = vmatpush3.bf16.msra.mxu0 %v1319_v22  ;;  %v1355_v6 = vld [vmem:[#allocation5 + $0x130] sm:$0xff]   ;;  %v1358_v9 = vld [vmem:[#allocation5 + $0x1f8] sm:$0xff]   ;;  %v96_v13 = vld [vmem:[#allocation2 + $0x68] sm:$0xff] }
  0x61   :  { %1174 = vmatpush3.bf16.msra.mxu1 %v1320_v23  ;;  %1153 = vmatprep.subr.bf16.mxu0 %v1321_v24  ;;  %v1356_v7 = vld [vmem:[#allocation5 + $0x1b0] sm:$0xff]   ;;  %v1359_v10 = vld [vmem:[#allocation5 + $0x138] sm:$0xff]   ;;  %v104_v16 = vpack.c.bf16 %v96_v13, %v88_v12  ;;  %v87_v18 = vld [vmem:[#allocation2 + $0x20] sm:$0xff] }
  0x62   :  { %1175 = vmatprep.subr.bf16.mxu1 %v1322_v25  ;;  %v1360_v11 = vld [vmem:[#allocation5 + $0x1b8] sm:$0xff]   ;;  %v95_v19 = vld [vmem:[#allocation2 + $0x60] sm:$0xff]  ;;  %v89_v20 = vld [vmem:[#allocation2 + $0x30] sm:$0xff]  ;;  %v1502_v25 = vmov 0.0  }
  0x63   :  { %v90_v14 = vld [vmem:[#allocation2 + $0x38] sm:$0xff]  ;;  %v103_v21 = vpack.c.bf16 %v95_v19, %v87_v18  ;;  %v97_v22 = vld [vmem:[#allocation2 + $0x70] sm:$0xff]  ;;  %v1361_v24 = vld [vmem:[#allocation7] sm:$0xff]  }
  0x64   :  { %1154 = vmatpush3.bf16.msra.mxu0 %v1323_v26  ;;  %v98_v15 = vld [vmem:[#allocation2 + $0x78] sm:$0xff]  ;;  %v105_v23 = vpack.c.bf16 %v97_v22, %v89_v20  ;;  %v1362_v26 = vld [vmem:[#allocation7 + $0x8] sm:$0xff]   ;;  %v1369_v33 = vld [vmem:[#allocation8] sm:$0xff]  }
  0x65   :  { %1176 = vmatpush3.bf16.msra.mxu1 %v1324_v27  ;;  %1155 = vmatprep.subr.bf16.mxu0 %v1325_v28  ;;  %v106_v17 = vpack.c.bf16 %v98_v15, %v90_v14  ;;  %v1363_v27 = vld [vmem:[#allocation7 + $0x10] sm:$0xff]   ;;  %v1364_v28 = vld [vmem:[#allocation7 + $0x18] sm:$0xff]   ;;  %v1370_v34 = vld [vmem:[#allocation8 + $0x8] sm:$0xff]  }
  0x66   :  { %1177 = vmatprep.subr.bf16.mxu1 %v1326_v29  ;;  %v1365_v29 = vld [vmem:[#allocation7 + $0x20] sm:$0xff]   ;;  %v1368_v32 = vld [vmem:[#allocation7 + $0x38] sm:$0xff]   ;;  %v1371_v35 = vld [vmem:[#allocation8 + $0x10] sm:$0xff]  }
  0x67   :  { %v1372_v36 = vld [vmem:[#allocation8 + $0x18] sm:$0xff]   ;;  %v1373_v37 = vld [vmem:[#allocation8 + $0x20] sm:$0xff]   ;;  %v1374_v38 = vld [vmem:[#allocation8 + $0x28] sm:$0xff]  }
  0x68   :  { %1156 = vmatpush3.bf16.msra.mxu0 %v1327_v30  ;;  %v1366_v30 = vld [vmem:[#allocation7 + $0x28] sm:$0xff]   ;;  %v1049_v41 = vld [vmem:[%s1647_s2] ss:$0 sm:$0xff]  ;;  %v1376_v12 = vld [vmem:[#allocation8 + $0x38] sm:$0xff]  }
  0x69   :  { %1178 = vmatpush3.bf16.msra.mxu1 %v1328_v31  ;;  %1185 = vmatprep.subr.bf16.mxu0 %v1329_v44  ;;  %v1367_v31 = vld [vmem:[#allocation7 + $0x30] sm:$0xff]   ;;  %v1114_v13 = vld [vmem:[%s1649_s4] ss:$0 sm:$0xff]  ;;  %s1465_s4 = scalar_lea.vmem %s1036_s9, 128 }
  0x6a   :  { %1207 = vmatprep.subr.bf16.mxu1 %v1330_v45  ;;  %p1466_p4 = scmp.ne.s32.totalorder %s1036_s9, %s1465_s4  ;;  %p1471_p6 = scmp.lt.s32.totalorder %s1465_s4, %s1465_s4 }
  0x6b   :  { %659 = vmatmul.mubr.bf16.vlgmr.msra.gmra.mrb[0].mxu0 %v99_v40 }
  0x6c   :  { %700 = vmatmul.mubr.bf16.vlgmr.msra.gmra.mrb[0].mxu1 %v101_v43  ;;  %1186 = vmatpush3.bf16.msra.mxu0 %v1331_v46  ;;  %p1472_p7 = por %p1471_p6, %p1470_p5 }
  0x6d   :  { %1208 = vmatpush3.bf16.msra.mxu1 %v1332_v47  ;;  %1187 = vmatprep.subr.bf16.mxu0 %v1333_v48 }
  0x6e   :  { %1209 = vmatprep.subr.bf16.mxu1 %v1334_v49  ;;  %740 = vmatprep.mubr.bf16.mxu0 %v104_v16  ;;  %p1473_p8 = pnand %p1472_p7, %p1466_p4 }
  0x6f   :  { %781 = vmatprep.mubr.bf16.mxu1 %v106_v17 }
  0x70   :  { %1188 = vmatpush3.bf16.msra.mxu0 %v1335_v50 }
  0x71   :  { %1210 = vmatpush3.bf16.msra.mxu1 %v1336_v51  ;;  %1189 = vmatprep.subr.bf16.mxu0 %v1337_v52 }
  0x72   :  { %1211 = vmatprep.subr.bf16.mxu1 %v1338_v53 }
  0x74   :  { %1190 = vmatpush3.bf16.msra.mxu0 %v1339_v54 }
  0x75   :  { %1212 = vmatpush3.bf16.msra.mxu1 %v1340_v55  ;;  %1191 = vmatprep.subr.bf16.mxu0 %v1341_v56 }
  0x76   :  { %1213 = vmatprep.subr.bf16.mxu1 %v1342_v57 }
  0x78   :  { %1192 = vmatpush3.bf16.msra.mxu0 %v1343_v58 }
  0x79   :  { %1214 = vmatpush3.bf16.msra.mxu1 %v1344_v59  ;;  %1193 = vmatprep.subr.bf16.mxu0 %v1345_v60 }
  0x7a   :  { %1215 = vmatprep.subr.bf16.mxu1 %v1346_v61 }
  0x7c   :  { %1194 = vmatpush3.bf16.msra.mxu0 %v1347_v62 }
  0x7d   :  { %1216 = vmatpush3.bf16.msra.mxu1 %v1348_v63  ;;  %1195 = vmatprep.subr.bf16.mxu0 %v1349_v0 }
  0x7e   :  { %1217 = vmatprep.subr.bf16.mxu1 %v1350_v1 }
  0x80   :  { %1196 = vmatpush3.bf16.msra.mxu0 %v1351_v2 }
  0x81   :  { %1218 = vmatpush3.bf16.msra.mxu1 %v1352_v3  ;;  %1197 = vmatprep.subr.bf16.mxu0 %v1353_v4 }
  0x82   :  { %1219 = vmatprep.subr.bf16.mxu1 %v1354_v5 }
  0x84   :  { %1198 = vmatpush3.bf16.msra.mxu0 %v1355_v6 }
  0x85   :  { %1220 = vmatpush3.bf16.msra.mxu1 %v1356_v7  ;;  %1199 = vmatprep.subr.bf16.mxu0 %v1357_v8 }
  0x86   :  { %1221 = vmatprep.subr.bf16.mxu1 %v1358_v9 }
  0x88   :  { %1200 = vmatpush3.bf16.msra.mxu0 %v1359_v10 }
  0x89   :  { %1222 = vmatpush3.bf16.msra.mxu1 %v1360_v11  ;;  %1247 = vmatprep.subr.bf16.mxu0 %v1502_v25  ;;  %v1375_v11 = vld [vmem:[#allocation8 + $0x30] sm:$0xff]  }
  0x8a   :  { %1267 = vmatprep.subr.bf16.mxu1 %v1502_v25 }
  0x8b   :  { %741 = vmatmul.mubr.bf16.vlgmr.msra.gmra.mrb[4].mxu0 %v103_v21 }
  0x8c   :  { %782 = vmatmul.mubr.bf16.vlgmr.msra.gmra.mrb[4].mxu1 %v105_v23  ;;  %1248 = vmatpush3.bf16.msra.mxu0 %v1361_v24  ;;  %v1123_v23 = vld [vmem:[%s1651_s6] ss:$0 sm:$0xff] }
  0x8d   :  { %1249 = vmatprep.subr.bf16.mxu0 %v1502_v25  ;;  %1263 = vmatprep.mubr.msk.bf16.mxu0 %vm1503_vm0, %v1502_v25 }
  0x8e   :  { %1283 = vmatprep.mubr.msk.bf16.mxu1 %vm1503_vm0, %v1502_v25  ;;  %1268 = vmatpush3.bf16.msra.mxu1 %v1369_v33 }
  0x8f   :  { %1269 = vmatprep.subr.bf16.mxu1 %v1502_v25 }
  0x90   :  { %1250 = vmatpush3.bf16.msra.mxu0 %v1362_v26 }
  0x91   :  { %1251 = vmatprep.subr.bf16.mxu0 %v1502_v25 }
  0x92   :  { %1270 = vmatpush3.bf16.msra.mxu1 %v1370_v34 }
  0x93   :  { %1271 = vmatprep.subr.bf16.mxu1 %v1502_v25 }
  0x94   :  { %1252 = vmatpush3.bf16.msra.mxu0 %v1363_v27 }
  0x95   :  { %1253 = vmatprep.subr.bf16.mxu0 %v1502_v25 }
  0x96   :  { %1272 = vmatpush3.bf16.msra.mxu1 %v1371_v35 }
  0x97   :  { %1273 = vmatprep.subr.bf16.mxu1 %v1502_v25 }
  0x98   :  { %1254 = vmatpush3.bf16.msra.mxu0 %v1364_v28 }
  0x99   :  { %1255 = vmatprep.subr.bf16.mxu0 %v1502_v25 }
  0x9a   :  { %1274 = vmatpush3.bf16.msra.mxu1 %v1372_v36 }
  0x9b   :  { %1275 = vmatprep.subr.bf16.mxu1 %v1502_v25 }
  0x9c   :  { %1256 = vmatpush3.bf16.msra.mxu0 %v1365_v29 }
  0x9d   :  { %1257 = vmatprep.subr.bf16.mxu0 %v1502_v25 }
  0x9e   :  { %1276 = vmatpush3.bf16.msra.mxu1 %v1373_v37 }
  0x9f   :  { %1277 = vmatprep.subr.bf16.mxu1 %v1502_v25 }
  0xa0   :  { %1258 = vmatpush3.bf16.msra.mxu0 %v1366_v30 }
  0xa1   :  { %1259 = vmatprep.subr.bf16.mxu0 %v1502_v25 }
  0xa2   :  { %1278 = vmatpush3.bf16.msra.mxu1 %v1374_v38 }
  0xa3   :  { %1279 = vmatprep.subr.bf16.mxu1 %v1502_v25 }
  0xa4   :  { %1260 = vmatpush3.bf16.msra.mxu0 %v1367_v31 }
  0xa5   :  { %1261 = vmatprep.subr.bf16.mxu0 %v1502_v25 }
  0xa6   :  { %1280 = vmatpush3.bf16.msra.mxu1 %v1375_v11 }
  0xa7   :  { %1281 = vmatprep.subr.bf16.mxu1 %v1502_v25 }
  0xa8   :  { %1262 = vmatpush3.bf16.msra.mxu0 %v1368_v32 }
  0xaa   :  { %1282 = vmatpush3.bf16.msra.mxu1 %v1376_v12 }
 0x13e   :  { %v1157_v39 = vpop.f32.mrb[0].mxu0 }
 0x13f   :  { %v1179_v40 = vpop.f32.mrb[0].mxu1  ;;  %v1158_v42 = vpop.f32.mrb[1].mxu0 }
 0x140   :  { %v1159_v43 = vadd.f32 %v1158_v42, %v1157_v39  ;;  %v1180_v44 = vpop.f32.mrb[1].mxu1  ;;  %v1160_v45 = vpop.f32.mrb[2].mxu0 }
 0x141   :  { %v1181_v46 = vadd.f32 %v1180_v44, %v1179_v40  ;;  %v1182_v47 = vpop.f32.mrb[2].mxu1  ;;  %v1161_v48 = vpop.f32.mrb[3].mxu0 }
 0x142   :  { %v661_v49 = vadd.f32 %v1159_v43, %v1049_v41  ;;  %v1162_v50 = vadd.f32 %v1161_v48, %v1160_v45  ;;  %v1183_v51 = vpop.f32.mrb[3].mxu1 }
 0x143   :  { %v1184_v52 = vadd.f32 %v1183_v51, %v1182_v47 }
 0x144   :  { %v702_v53 = vadd.f32 %v1181_v46, %v661_v49  ;;  %v664_v54 = vadd.f32 %v1162_v50, %v1049_v41 }
 0x146   :  { %v705_v55 = vadd.f32 %v1184_v52, %v664_v54 }
 0x15e   :  { %v1201_v56 = vpop.f32.mrb[4].mxu0 }
 0x15f   :  { %v1223_v57 = vpop.f32.mrb[4].mxu1  ;;  %v1202_v58 = vpop.f32.mrb[5].mxu0 }
 0x160   :  { %v1203_v59 = vadd.f32 %v1202_v58, %v1201_v56  ;;  %v1224_v60 = vpop.f32.mrb[5].mxu1  ;;  %v1204_v61 = vpop.f32.mrb[6].mxu0 }
 0x161   :  { %v1225_v62 = vadd.f32 %v1224_v60, %v1223_v57  ;;  %v1226_v63 = vpop.f32.mrb[6].mxu1  ;;  %v1205_v0 = vpop.f32.mrb[7].mxu0 }
 0x162   :  { %v743_v1 = vadd.f32 %v1203_v59, %v702_v53  ;;  %v1206_v2 = vadd.f32 %v1205_v0, %v1204_v61  ;;  %v1227_v3 = vpop.f32.mrb[7].mxu1 }
 0x163   :  { %v1228_v4 = vadd.f32 %v1227_v3, %v1226_v63 }
 0x164   :  { %v784_v5 = vadd.f32 %v1225_v62, %v743_v1  ;;  %v746_v6 = vadd.f32 %v1206_v2, %v705_v55 }
 0x166   :  { %v787_v7 = vadd.f32 %v1228_v4, %v746_v6  ;;  %v790_v8 = vmax.f32 %v784_v5, 0.0 }
 0x168   :  { %v791_v9 = vmax.f32 %v787_v7, 0.0 }
 0x16a   :  { %v792_v10 = vpack.c.bf16 %v791_v9, %v790_v8 }
 0x16c   :  { %1264 = vmatmul.mubr.bf16.vlgmr.msra.gmra.mrb[8].mxu0 %v792_v10 }
 0x23f   :  { %v898_v14 = vpop.f32.mrb[8].mxu0 }
 0x240   :  { %v899_v15 = vadd.f32 %v1114_v13, %v898_v14  ;;  %v1265_v16 = vpop.f32.mrb[9].mxu0 }
 0x241   :  { %v901_v17 = vpop.f32.mrb[10].mxu0 }
 0x242   :  { %v902_v18 = vadd.f32 %v1114_v13, %v901_v17  ;;  %v1266_v19 = vpop.f32.mrb[11].mxu0  ;;  %v905_v20 = vmax.f32 %v899_v15, 0.0 }
 0x244   :  { %v906_v21 = vmax.f32 %v902_v18, 0.0 }
 0x246   :  { %v907_v22 = vpack.c.bf16 %v906_v21, %v905_v20 }
 0x248   :  { %1284 = vmatmul.mubr.bf16.vlgmr.msra.gmra.mrb[8].mxu1 %v907_v22 }
 0x31b   :  { %v1013_v24 = vpop.f32.mrb[8].mxu1 }
 0x31c   :  { %v1285_v25 = vpop.f32.mrb[9].mxu1  ;;  %v1014_v27 = vadd.f32 %v1123_v23, %v1013_v24 }
 0x31d   :  { %v1016_v26 = vpop.f32.mrb[10].mxu1 }
 0x31e   :  { %v1017_v28 = vadd.f32 %v1123_v23, %v1016_v26  ;;  %v1286_v29 = vpop.f32.mrb[11].mxu1 }
 0x320   :  { %v1139_v30 = vpack.c.bf16 %v1017_v28, %v1014_v27 }
 0x322   :  { %1140 = vst [vmem:[#allocation10] sm:$0xff] %v1139_v30  }
 0x323   :  { %1476 = shalt.err (!%p1473_p8)
}
 0x324   :  { %s1477_s13 = scalar_lea.hbm %s1652_s7, 128 }
 0x325   :  { %p1478_p9 = scmp.ne.s32.totalorder %s1652_s7, %s1477_s13  ;;  %p1481_p10 = scmp.lt.u32.totalorder %s1477_s13, %s1652_s7 }
 0x327   :  { %p1483_p11 = pnand %p1481_p10, %p1478_p9 }
 0x329   :  { %1486 = shalt.err (!%p1483_p11)
}
 0x32a   :  { %1041 = dma.vmem_to_hbm [thread:$0]  %s1036_s9, 128, %s1652_s7, [#allocation4], %s1496_s11, %s1496_s11, %s1497_s12  }
 0x32b   :  { %1493 = dma.done.wait [#allocation4], 128  }
 0x32c   :  { %1494 = vsyncadd [#allocation4], 4294967168 }
 0x32d   :  { %1045 = vsyncpa [#allocation3], 1 }
 0x32e   :  { %1046 = vsyncpa [#allocation6], 1 }
 0x32f   :  { %1047 = vsyncpa [#allocation9], 1 }
 0x330   :  { %1048 = vsyncpa [#allocation4], 1 }

</bundles_post_ra>
